<compile_context>
chip_gen: v5e
topology: v5e:2x2
jax: 0.10.0
libtpu: 0.0.40
codegen_flags: <defaults>
</compile_context>

<pallas_src>
import functools

import jax
import jax.numpy as jnp
from jax.experimental import pallas as pl
from jax.experimental.pallas import tpu as pltpu


def _conv_block_kernel(x_ref, w_ref, cb_ref, g_ref, b_ref, o_ref, y_ref,
                       *, kernel_size, conv_len, pool_k, pool_len, eps):
    # x_ref : (L_pad, C)      zero-padded input, channels-last
    # w_ref : (K, C_in, C_out) conv weight, pre-transposed for (L,C) @ (C,C)
    # cb_ref: (1, C)          conv bias
    # g_ref : (1, C)          LayerNorm weight
    # b_ref : (1, C)          LayerNorm bias
    # o_ref : (pool_len, C)   output block
    # y_ref : (conv_len, C)   f32 VMEM scratch (pre-pool activations)

    # --- Conv1d(kernel_size, padding=K//2): K shifted matmuls on the MXU ---
    acc = jnp.dot(x_ref[pl.ds(0, conv_len), :], w_ref[0],
                  preferred_element_type=jnp.float32)
    for k in range(1, kernel_size):
        acc = acc + jnp.dot(x_ref[pl.ds(k, conv_len), :], w_ref[k],
                            preferred_element_type=jnp.float32)
    acc = acc + cb_ref[...]

    # --- LayerNorm over channels (lane axis); rsqrt runs on the EUP slot ---
    u = jnp.mean(acc, axis=-1, keepdims=True)
    xc = acc - u
    var = jnp.mean(xc * xc, axis=-1, keepdims=True)
    y = xc * jax.lax.rsqrt(var + eps)
    y = y * g_ref[...] + b_ref[...]

    # --- ReLU ---
    y = jnp.maximum(y, 0.0)

    if pool_k <= 1:
        # MaxPool1d(1) (or pooling disabled) is the identity.
        o_ref[...] = y[:pool_len, :].astype(o_ref.dtype)
        return

    # --- MaxPool1d(pool_k), stride = pool_k: sublane-strided reads ---
    y_ref[...] = y
    m = y_ref[pl.ds(0, pool_len, stride=pool_k), :]
    for j in range(1, pool_k):
        m = jnp.maximum(m, y_ref[pl.ds(j, pool_len, stride=pool_k), :])
    o_ref[...] = m.astype(o_ref.dtype)


def conv_block(x, conv_w, conv_b, ln_w, ln_b, *, kernel_size, pooling=True):
    """ConvBlock forward.

    x      : (B, C, L) float32  channels-first, as in PyTorch
    conv_w : (C_out, C_in, K)   Conv1d weight (PyTorch layout)
    conv_b : (C_out,)           Conv1d bias
    ln_w   : (C,)               LayerNorm weight
    ln_b   : (C,)               LayerNorm bias
    returns  (B, C, L_pool) float32
    """
    B, C, L = x.shape
    K = kernel_size
    pad = K // 2
    conv_len = L + 2 * pad - K + 1
    pool_k = max(K // 2, 1) if pooling else 1
    pool_len = conv_len // pool_k if pool_k > 1 else conv_len
    L_pad = L + 2 * pad

    # Channels-last layout + zero padding along L (layout plumbing in XLA).
    x_lc = jnp.pad(jnp.transpose(x, (0, 2, 1)), ((0, 0), (pad, pad), (0, 0)))
    w_k = jnp.transpose(conv_w, (2, 1, 0))      # (K, C_in, C_out)
    cb = conv_b.reshape(1, C)
    g = ln_w.reshape(1, C)
    b = ln_b.reshape(1, C)

    kernel = functools.partial(
        _conv_block_kernel, kernel_size=K, conv_len=conv_len,
        pool_k=pool_k, pool_len=pool_len, eps=1e-6)

    out = pl.pallas_call(
        kernel,
        out_shape=jax.ShapeDtypeStruct((B, pool_len, C), x.dtype),
        grid_spec=pltpu.PrefetchScalarGridSpec(
            num_scalar_prefetch=0,
            grid=(B,),
            in_specs=[
                # One batch element per grid step (squeezed leading dim).
                pl.BlockSpec((None, L_pad, C), lambda bi: (bi, 0, 0)),
                # Params: constant index maps -> stay resident across steps.
                pl.BlockSpec((K, C, C), lambda bi: (0, 0, 0)),
                pl.BlockSpec((1, C), lambda bi: (0, 0)),
                pl.BlockSpec((1, C), lambda bi: (0, 0)),
                pl.BlockSpec((1, C), lambda bi: (0, 0)),
            ],
            out_specs=pl.BlockSpec((None, pool_len, C), lambda bi: (bi, 0, 0)),
            scratch_shapes=[pltpu.VMEM((conv_len, C), jnp.float32)],
        ),
        compiler_params=pltpu.CompilerParams(
            dimension_semantics=("parallel",)),
    )(x_lc, w_k, cb, g, b)

    return jnp.transpose(out, (0, 2, 1))        # back to (B, C, L_pool)


def _reference(x, conv_w, conv_b, ln_w, ln_b, *, kernel_size, pooling=True):
    # Pure-JAX mirror of the PyTorch ConvBlock.
    K = kernel_size
    pad = K // 2
    B, C, L = x.shape
    xp = jnp.pad(x, ((0, 0), (0, 0), (pad, pad)))
    conv_len = L + 2 * pad - K + 1
    y = conv_b[None, :, None]
    for k in range(K):
        y = y + jnp.einsum("oi,bil->bol", conv_w[:, :, k],
                           xp[:, :, k:k + conv_len])
    u = y.mean(axis=1, keepdims=True)
    s = ((y - u) ** 2).mean(axis=1, keepdims=True)
    y = (y - u) / jnp.sqrt(s + 1e-6)
    y = ln_w[None, :, None] * y + ln_b[None, :, None]
    y = jnp.maximum(y, 0.0)
    pool_k = max(K // 2, 1) if pooling else 1
    if pool_k > 1:
        pool_len = conv_len // pool_k
        y = y[:, :, :pool_len * pool_k].reshape(B, C, pool_len, pool_k).max(-1)
    return y


if __name__ == "__main__":
    key = jax.random.PRNGKey(0)
    B, C, L, K = 2, 4, 16, 5     # kernel_num=4, kernel_size=5 -> pool window 2

    kx, kw, kb, kg, kbb = jax.random.split(key, 5)
    x = jax.random.normal(kx, (B, C, L), dtype=jnp.float32)
    conv_w = jax.random.normal(kw, (C, C, K), dtype=jnp.float32) * 0.2
    conv_b = jax.random.normal(kb, (C,), dtype=jnp.float32) * 0.1
    ln_w = 1.0 + 0.1 * jax.random.normal(kg, (C,), dtype=jnp.float32)
    ln_b = 0.1 * jax.random.normal(kbb, (C,), dtype=jnp.float32)

    out = jax.block_until_ready(
        conv_block(x, conv_w, conv_b, ln_w, ln_b, kernel_size=K, pooling=True))
    ref = _reference(x, conv_w, conv_b, ln_w, ln_b, kernel_size=K, pooling=True)

    assert out.shape == ref.shape == (B, C, L // (K // 2)), (out.shape, ref.shape)
    assert jnp.allclose(out, ref, atol=1e-4, rtol=1e-4), (out, ref)
    print("KERNEL_OK")
</pallas_src>

<mosaic_0001>
module attributes {stable_mosaic.version = 11 : i64} {
  func.func @_conv_block_kernel(%arg0: i32, %arg1: memref<1x20x4xf32, #tpu.memory_space<vmem>>, %arg2: memref<5x4x4xf32, #tpu.memory_space<vmem>>, %arg3: memref<1x4xf32, #tpu.memory_space<vmem>>, %arg4: memref<1x4xf32, #tpu.memory_space<vmem>>, %arg5: memref<1x4xf32, #tpu.memory_space<vmem>>, %arg6: memref<1x8x4xf32, #tpu.memory_space<vmem>>, %arg7: memref<16x4xf32, #tpu.memory_space<vmem>>) attributes {dimension_semantics = [#tpu.dimension_semantics<parallel>], iteration_bounds = array<i64: 2>, scalar_prefetch = 0 : i64, scratch_operands = 1 : i64, tpu.core_type = #tpu.core_type<tc>, window_params = [{transform_indices = @transform_0, window_bounds = array<i64: 1, 20, 4>}, {pipeline_mode = #tpu.pipeline_mode<synchronous>, transform_indices = @transform_1, window_bounds = array<i64: 5, 4, 4>}, {pipeline_mode = #tpu.pipeline_mode<synchronous>, transform_indices = @transform_2, window_bounds = array<i64: 1, 4>}, {pipeline_mode = #tpu.pipeline_mode<synchronous>, transform_indices = @transform_3, window_bounds = array<i64: 1, 4>}, {pipeline_mode = #tpu.pipeline_mode<synchronous>, transform_indices = @transform_4, window_bounds = array<i64: 1, 4>}, {transform_indices = @transform_5, window_bounds = array<i64: 1, 8, 4>}]} {
    %c0 = arith.constant 0 : index
    %c0_0 = arith.constant 0 : index
    %c0_1 = arith.constant 0 : index
    %0 = vector.load %arg1[%c0, %c0_0, %c0_1] : memref<1x20x4xf32, #tpu.memory_space<vmem>>, vector<1x16x4xf32>
    %1 = vector.shape_cast %0 : vector<1x16x4xf32> to vector<16x4xf32>
    %c0_2 = arith.constant 0 : index
    %c0_3 = arith.constant 0 : index
    %c0_4 = arith.constant 0 : index
    %2 = vector.load %arg2[%c0_2, %c0_3, %c0_4] : memref<5x4x4xf32, #tpu.memory_space<vmem>>, vector<1x4x4xf32>
    %3 = vector.shape_cast %2 : vector<1x4x4xf32> to vector<4x4xf32>
    %cst = arith.constant dense<0.000000e+00> : vector<16x4xf32>
    %4 = tpu.matmul %1, %3, %cst {dimension_numbers = #tpu.dot_dimension_numbers<[1], [0], [0], [1], [0, 0, 1, 1], [], []>} : vector<16x4xf32>, vector<4x4xf32>, vector<16x4xf32> -> vector<16x4xf32>
    %c0_5 = arith.constant 0 : index
    %c1 = arith.constant 1 : index
    %c0_6 = arith.constant 0 : index
    %5 = vector.load %arg1[%c0_5, %c1, %c0_6] : memref<1x20x4xf32, #tpu.memory_space<vmem>>, vector<1x16x4xf32>
    %6 = vector.shape_cast %5 : vector<1x16x4xf32> to vector<16x4xf32>
    %c1_7 = arith.constant 1 : index
    %c0_8 = arith.constant 0 : index
    %c0_9 = arith.constant 0 : index
    %7 = vector.load %arg2[%c1_7, %c0_8, %c0_9] : memref<5x4x4xf32, #tpu.memory_space<vmem>>, vector<1x4x4xf32>
    %8 = vector.shape_cast %7 : vector<1x4x4xf32> to vector<4x4xf32>
    %cst_10 = arith.constant dense<0.000000e+00> : vector<16x4xf32>
    %9 = tpu.matmul %6, %8, %cst_10 {dimension_numbers = #tpu.dot_dimension_numbers<[1], [0], [0], [1], [0, 0, 1, 1], [], []>} : vector<16x4xf32>, vector<4x4xf32>, vector<16x4xf32> -> vector<16x4xf32>
    %10 = arith.addf %4, %9 : vector<16x4xf32>
    %c0_11 = arith.constant 0 : index
    %c2 = arith.constant 2 : index
    %c0_12 = arith.constant 0 : index
    %11 = vector.load %arg1[%c0_11, %c2, %c0_12] : memref<1x20x4xf32, #tpu.memory_space<vmem>>, vector<1x16x4xf32>
    %12 = vector.shape_cast %11 : vector<1x16x4xf32> to vector<16x4xf32>
    %c2_13 = arith.constant 2 : index
    %c0_14 = arith.constant 0 : index
    %c0_15 = arith.constant 0 : index
    %13 = vector.load %arg2[%c2_13, %c0_14, %c0_15] : memref<5x4x4xf32, #tpu.memory_space<vmem>>, vector<1x4x4xf32>
    %14 = vector.shape_cast %13 : vector<1x4x4xf32> to vector<4x4xf32>
    %cst_16 = arith.constant dense<0.000000e+00> : vector<16x4xf32>
    %15 = tpu.matmul %12, %14, %cst_16 {dimension_numbers = #tpu.dot_dimension_numbers<[1], [0], [0], [1], [0, 0, 1, 1], [], []>} : vector<16x4xf32>, vector<4x4xf32>, vector<16x4xf32> -> vector<16x4xf32>
    %16 = arith.addf %10, %15 : vector<16x4xf32>
    %c0_17 = arith.constant 0 : index
    %c3 = arith.constant 3 : index
    %c0_18 = arith.constant 0 : index
    %17 = vector.load %arg1[%c0_17, %c3, %c0_18] : memref<1x20x4xf32, #tpu.memory_space<vmem>>, vector<1x16x4xf32>
    %18 = vector.shape_cast %17 : vector<1x16x4xf32> to vector<16x4xf32>
    %c3_19 = arith.constant 3 : index
    %c0_20 = arith.constant 0 : index
    %c0_21 = arith.constant 0 : index
    %19 = vector.load %arg2[%c3_19, %c0_20, %c0_21] : memref<5x4x4xf32, #tpu.memory_space<vmem>>, vector<1x4x4xf32>
    %20 = vector.shape_cast %19 : vector<1x4x4xf32> to vector<4x4xf32>
    %cst_22 = arith.constant dense<0.000000e+00> : vector<16x4xf32>
    %21 = tpu.matmul %18, %20, %cst_22 {dimension_numbers = #tpu.dot_dimension_numbers<[1], [0], [0], [1], [0, 0, 1, 1], [], []>} : vector<16x4xf32>, vector<4x4xf32>, vector<16x4xf32> -> vector<16x4xf32>
    %22 = arith.addf %16, %21 : vector<16x4xf32>
    %c0_23 = arith.constant 0 : index
    %c4 = arith.constant 4 : index
    %c0_24 = arith.constant 0 : index
    %23 = vector.load %arg1[%c0_23, %c4, %c0_24] : memref<1x20x4xf32, #tpu.memory_space<vmem>>, vector<1x16x4xf32>
    %24 = vector.shape_cast %23 : vector<1x16x4xf32> to vector<16x4xf32>
    %c4_25 = arith.constant 4 : index
    %c0_26 = arith.constant 0 : index
    %c0_27 = arith.constant 0 : index
    %25 = vector.load %arg2[%c4_25, %c0_26, %c0_27] : memref<5x4x4xf32, #tpu.memory_space<vmem>>, vector<1x4x4xf32>
    %26 = vector.shape_cast %25 : vector<1x4x4xf32> to vector<4x4xf32>
    %cst_28 = arith.constant dense<0.000000e+00> : vector<16x4xf32>
    %27 = tpu.matmul %24, %26, %cst_28 {dimension_numbers = #tpu.dot_dimension_numbers<[1], [0], [0], [1], [0, 0, 1, 1], [], []>} : vector<16x4xf32>, vector<4x4xf32>, vector<16x4xf32> -> vector<16x4xf32>
    %28 = arith.addf %22, %27 : vector<16x4xf32>
    %c0_29 = arith.constant 0 : index
    %c0_30 = arith.constant 0 : index
    %29 = vector.load %arg3[%c0_29, %c0_30] : memref<1x4xf32, #tpu.memory_space<vmem>>, vector<1x4xf32>
    %30 = vector.broadcast %29 : vector<1x4xf32> to vector<16x4xf32>
    %31 = arith.addf %28, %30 : vector<16x4xf32>
    %cst_31 = arith.constant dense<0.000000e+00> : vector<16xf32>
    %32 = vector.multi_reduction <add>, %31, %cst_31 [1] : vector<16x4xf32> to vector<16xf32>
    %33 = vector.shape_cast %32 : vector<16xf32> to vector<16x1xf32>
    %cst_32 = arith.constant 4.000000e+00 : f32
    %34 = vector.broadcast %cst_32 : f32 to vector<16x1xf32>
    %35 = arith.divf %33, %34 : vector<16x1xf32>
    %36 = vector.broadcast %35 : vector<16x1xf32> to vector<16x4xf32>
    %37 = arith.subf %31, %36 : vector<16x4xf32>
    %38 = arith.mulf %37, %37 : vector<16x4xf32>
    %cst_33 = arith.constant dense<0.000000e+00> : vector<16xf32>
    %39 = vector.multi_reduction <add>, %38, %cst_33 [1] : vector<16x4xf32> to vector<16xf32>
    %40 = vector.shape_cast %39 : vector<16xf32> to vector<16x1xf32>
    %cst_34 = arith.constant 4.000000e+00 : f32
    %41 = vector.broadcast %cst_34 : f32 to vector<16x1xf32>
    %42 = arith.divf %40, %41 : vector<16x1xf32>
    %cst_35 = arith.constant 9.99999997E-7 : f32
    %43 = vector.broadcast %cst_35 : f32 to vector<16x1xf32>
    %44 = arith.addf %42, %43 : vector<16x1xf32>
    %45 = math.rsqrt %44 : vector<16x1xf32>
    %46 = vector.broadcast %45 : vector<16x1xf32> to vector<16x4xf32>
    %47 = arith.mulf %37, %46 : vector<16x4xf32>
    %c0_36 = arith.constant 0 : index
    %c0_37 = arith.constant 0 : index
    %48 = vector.load %arg4[%c0_36, %c0_37] : memref<1x4xf32, #tpu.memory_space<vmem>>, vector<1x4xf32>
    %49 = vector.broadcast %48 : vector<1x4xf32> to vector<16x4xf32>
    %50 = arith.mulf %47, %49 : vector<16x4xf32>
    %c0_38 = arith.constant 0 : index
    %c0_39 = arith.constant 0 : index
    %51 = vector.load %arg5[%c0_38, %c0_39] : memref<1x4xf32, #tpu.memory_space<vmem>>, vector<1x4xf32>
    %52 = vector.broadcast %51 : vector<1x4xf32> to vector<16x4xf32>
    %53 = arith.addf %50, %52 : vector<16x4xf32>
    %cst_40 = arith.constant 0.000000e+00 : f32
    %54 = vector.broadcast %cst_40 : f32 to vector<16x4xf32>
    %55 = arith.maximumf %53, %54 : vector<16x4xf32>
    %c0_41 = arith.constant 0 : index
    %c0_42 = arith.constant 0 : index
    %56 = vector.load %arg7[%c0_41, %c0_42] : memref<16x4xf32, #tpu.memory_space<vmem>>, vector<16x4xf32>
    tpu.vector_store %arg7[%c0_41, %c0_42], %55 {strides = array<i32>} : memref<16x4xf32, #tpu.memory_space<vmem>>, vector<16x4xf32>,
    %c0_43 = arith.constant 0 : index
    %c0_44 = arith.constant 0 : index
    %57 = tpu.strided_load %arg7[%c0_43, %c0_44] {strides = array<i32: 2, 1>} : memref<16x4xf32, #tpu.memory_space<vmem>>, vector<8x4xf32>
    %c1_45 = arith.constant 1 : index
    %c0_46 = arith.constant 0 : index
    %58 = tpu.strided_load %arg7[%c1_45, %c0_46] {strides = array<i32: 2, 1>} : memref<16x4xf32, #tpu.memory_space<vmem>>, vector<8x4xf32>
    %59 = arith.maximumf %57, %58 : vector<8x4xf32>
    %c0_47 = arith.constant 0 : index
    %c0_48 = arith.constant 0 : index
    %c0_49 = arith.constant 0 : index
    %60 = vector.load %arg6[%c0_47, %c0_48, %c0_49] : memref<1x8x4xf32, #tpu.memory_space<vmem>>, vector<1x8x4xf32>
    %61 = vector.shape_cast %60 : vector<1x8x4xf32> to vector<8x4xf32>
    %62 = vector.shape_cast %59 : vector<8x4xf32> to vector<1x8x4xf32>
    tpu.vector_store %arg6[%c0_47, %c0_48, %c0_49], %62 {strides = array<i32>} : memref<1x8x4xf32, #tpu.memory_space<vmem>>, vector<1x8x4xf32>,
    return
  }
  func.func @transform_0(%arg0: i32) -> (i32, i32, i32) {
    %c0_i32 = arith.constant 0 : i32
    %c0_i32_0 = arith.constant 0 : i32
    %c0_i32_1 = arith.constant 0 : i32
    return %arg0, %c0_i32, %c0_i32_0 : i32, i32, i32
  }
  func.func @transform_1(%arg0: i32) -> (i32, i32, i32) {
    %c0_i32 = arith.constant 0 : i32
    %c0_i32_0 = arith.constant 0 : i32
    %c0_i32_1 = arith.constant 0 : i32
    %c0_i32_2 = arith.constant 0 : i32
    return %c0_i32, %c0_i32_0, %c0_i32_1 : i32, i32, i32
  }
  func.func @transform_2(%arg0: i32) -> (i32, i32) {
    %c0_i32 = arith.constant 0 : i32
    %c0_i32_0 = arith.constant 0 : i32
    %c0_i32_1 = arith.constant 0 : i32
    return %c0_i32, %c0_i32_0 : i32, i32
  }
  func.func @transform_3(%arg0: i32) -> (i32, i32) {
    %c0_i32 = arith.constant 0 : i32
    %c0_i32_0 = arith.constant 0 : i32
    %c0_i32_1 = arith.constant 0 : i32
    return %c0_i32, %c0_i32_0 : i32, i32
  }
  func.func @transform_4(%arg0: i32) -> (i32, i32) {
    %c0_i32 = arith.constant 0 : i32
    %c0_i32_0 = arith.constant 0 : i32
    %c0_i32_1 = arith.constant 0 : i32
    return %c0_i32, %c0_i32_0 : i32, i32
  }
  func.func @transform_5(%arg0: i32) -> (i32, i32, i32) {
    %c0_i32 = arith.constant 0 : i32
    %c0_i32_0 = arith.constant 0 : i32
    %c0_i32_1 = arith.constant 0 : i32
    return %arg0, %c0_i32, %c0_i32_0 : i32, i32, i32
  }
}

</mosaic_0001>

<bundles_post_ra>
// kernel: tpu_custom_call.1
= control target key start
LH: loop header
LB: loop body
LE: loop exit
PB: predicated region body
PF: predicated region fallthrough
CT: control target
= control target key end

     0   :  { %s628_s18 = smov 0   ;;  %s690_s0 = inlined_call_operand.vmem [shape: f32[2,20,4], index: 0, kind: input, shape index: {}]   ;;  %s691_s1 = inlined_call_operand.vmem [shape: f32[5,4,4], index: 1, kind: input, shape index: {}]   ;;  %s692_s2 = inlined_call_operand.vmem [shape: f32[1,4], index: 2, kind: input, shape index: {}]   ;;  %s693_s3 = inlined_call_operand.vmem [shape: f32[1,4], index: 3, kind: input, shape index: {}]   ;;  %s694_s4 = inlined_call_operand.vmem [shape: f32[1,4], index: 4, kind: input, shape index: {}]   ;;  %s695_s5 = inlined_call_operand.vmem [shape: f32[2,8,4], index: 5, kind: output, shape index: {}]  }
   0x1 LB: > { %s541_s19 = sadd.s32 4294967295, %s595_s18   ;;  %p545_p0 = scmp.ge.s32.totalorder %s595_s18, 1  ;;  %s595_s18 = sphi %s628_s18, %s15_s18  }
   0x2   : > { %p187_p1 = scmp.lt.s32.totalorder %s595_s18, 3 }
   0x4   : > { %p188_p2 = pnand %p545_p0, %p187_p1 }
   0x5   : > { %p214_p3 = scmp.lt.s32.totalorder (!%p188_p2), %s541_s19, 1 }
   0x6   : > { %191 = sbr.rel (%p188_p2) target bundleno = 450 (0x1c2), region = 40 }
   0xb   : > { %v548_v0 = vld [vmem:[%s691_s1 + $0x4] sm:$0xf]  ;;  %vm237_vm0 = vcmask 1043456   ;;  %v225_v1 = vld [vmem:[%s691_s1] sm:$0xf]  ;;  %s697_s19 = smov (!%p214_p3, %s541_s19), 1 }
   0xc   : > { %569 = vmatpush.msk.msra.mxu1 %vm237_vm0, %v548_v0  ;;  %v555_v2 = vld [vmem:[%s691_s1 + $0x8] sm:$0xf]  ;;  %549 = vmatpush.msk.msra.mxu0 %vm237_vm0, %v548_v0  ;;  %v559_v3 = vld [vmem:[%s691_s1 + $0xc] sm:$0xf]  ;;  %v563_v4 = vld [vmem:[%s691_s1 + $0x10] sm:$0xf] }
   0xd   : > { %556 = vmatpush.msk.msra.mxu2 %vm237_vm0, %v555_v2  ;;  %560 = vmatpush.msk.msra.mxu3 %vm237_vm0, %v559_v3  ;;  %s570_s30 = smul.u32 24, %s697_s19  ;;  %vm230_vm1 = vcmask 31744   ;;  %v580_v24 = vld [vmem:[%s692_s2] ss:$0 sm:$0xff]  ;;  %v597_v38 = vmov 4.0   ;;  %s547_s15 = sshll.u32 %s697_s19, 3 }
   0xe   : > { %552 = vmatpush.msk.msrb.mxu1 %vm237_vm0, %v225_v1  ;;  %564 = vmatpush.msk.msrb.mxu0 %vm237_vm0, %v563_v4  ;;  %583 = vrcp.f32 %v597_v38  ;;  %s222_s20 = scalar_lea.vmem %s695_s5, %s547_s15 }
   0xf   : > { %s218_s8 = scalar_lea.vmem %s690_s0, %s570_s30 }
  0x10   : > { %v227_v5 = vld [vmem:[%s218_s8 + $0x9] sm:$0xff]  ;;  %v226_v7 = vld [vmem:[%s218_s8 + $0x1] sm:$0xff] }
  0x11   : > { %v296_v6 = vld [vmem:[%s218_s8 + $0x2] sm:$0xff]  ;;  %551 = vmatmul.msk.f32.vlgmr.msra.gmra.mxu1 %vm230_vm1, %v227_v5  ;;  %550 = vmatmul.msk.f32.vlgmr.msra.gmra.mxu0 %vm230_vm1, %v226_v7  ;;  %v297_v10 = vld [vmem:[%s218_s8 + $0xa] sm:$0xff]  ;;  %v581_v5 = vld [vmem:[%s693_s3] ss:$0 sm:$0xff] }
  0x12   : > { %557 = vmatmul.msk.f32.vlgmr.msra.gmra.mxu2 %vm230_vm1, %v296_v6  ;;  %v334_v8 = vld [vmem:[%s218_s8 + $0x3] sm:$0xff]  ;;  %v335_v11 = vld [vmem:[%s218_s8 + $0xb] sm:$0xff] }
  0x13   : > { %561 = vmatmul.msk.f32.vlgmr.msra.gmra.mxu3 %vm230_vm1, %v334_v8  ;;  %v223_v9 = vld [vmem:[%s218_s8] sm:$0xff]  ;;  %v224_v13 = vld [vmem:[%s218_s8 + $0x8] sm:$0xff] }
  0x14   : > { %v372_v12 = vld [vmem:[%s218_s8 + $0x4] sm:$0xff]  ;;  %v373_v14 = vld [vmem:[%s218_s8 + $0xc] sm:$0xff]  ;;  %v584_v39 = vpop.eup %583  ;;  %v582_v8 = vld [vmem:[%s694_s4] ss:$0 sm:$0xff] }
  0x15   : > { %v423_v40 = vmul.f32 4.0, %v584_v39  ;;  %vm427_vm2 = vweird.f32 %v584_v39 }
  0x17   : > { %v424_v41 = vsub.f32 1.0, %v423_v40 }
  0x19   : > { %553 = vmatmul.msk.f32.vlgmr.msrb.gmra.mxu1 %vm230_vm1, %v223_v9  ;;  %565 = vmatmul.msk.f32.vlgmr.msrb.gmra.mxu0 %vm230_vm1, %v372_v12  ;;  %v425_v42 = vmul.f32 %v584_v39, %v424_v41 }
  0x1a   : > { %558 = vmatmul.msk.f32.gmra.mxu2 %vm230_vm1, %v297_v10 }
  0x1b   : > { %562 = vmatmul.msk.f32.gmra.mxu3 %vm230_vm1, %v335_v11  ;;  %v426_v43 = vadd.f32 %v584_v39, %v425_v42 }
  0x1d   : > { %v428_v44 = vsel %vm427_vm2, %v584_v39, %v426_v43 }
  0x21   : > { %554 = vmatmul.msk.f32.gmra.mxu1 %vm230_vm1, %v224_v13  ;;  %566 = vmatmul.msk.f32.gmra.mxu0 %vm230_vm1, %v373_v14 }
  0x8e   : > { %v261_v15 = vpop.f32.mrf.mxu1  ;;  %v258_v16 = vpop.f32.mrf.mxu0 }
  0x95   : > { %v326_v17 = vpop.f32.mrf.mxu2 }
  0x96   : > { %v290_v18 = vpop.f32.mrf.mxu1  ;;  %v364_v19 = vpop.f32.mrf.mxu3 }
  0x97   : > { %v291_v20 = vadd.f32 %v290_v18, %v258_v16  ;;  %v402_v21 = vpop.f32.mrf.mxu0 }
  0x99   : > { %v332_v22 = vadd.f32 %v326_v17, %v291_v20 }
  0x9b   : > { %v370_v23 = vadd.f32 %v364_v19, %v332_v22 }
  0x9d   : > { %v408_v25 = vadd.f32 %v402_v21, %v370_v23  ;;  %v329_v27 = vpop.f32.mrf.mxu2 }
  0x9e   : > { %v293_v26 = vpop.f32.mrf.mxu1  ;;  %v367_v30 = vpop.f32.mrf.mxu3 }
  0x9f   : > { %v294_v28 = vadd.f32 %v293_v26, %v261_v15  ;;  %v414_v29 = vadd.f32 %v580_v24, %v408_v25  ;;  %v405_v33 = vpop.f32.mrf.mxu0 }
  0xa1   : > { %v333_v31 = vadd.f32 %v329_v27, %v294_v28  ;;  %v416_v32 = vsel %vm230_vm1, %v414_v29, 0.0 }
  0xa2   : > { %417 = vadd.xlane.f32.xlu0 %v416_v32 }
  0xa3   : > { %v371_v34 = vadd.f32 %v367_v30, %v333_v31 }
  0xa5   : > { %v409_v35 = vadd.f32 %v405_v33, %v371_v34 }
  0xa7   : > { %v415_v36 = vadd.f32 %v580_v24, %v409_v35 }
  0xa9   : > { %v419_v37 = vsel %vm230_vm1, %v415_v36, 0.0 }
  0xaa   : > { %420 = vadd.xlane.f32.xlu0 %v419_v37 }
 0x115   : > { %v418_v45 = vpop.xlane.xlu0 %417 }
 0x116   : > { %v429_v46 = vmul.f32 %v428_v44, %v418_v45 }
 0x118   : > { %v431_v47 = vsub.f32 %v414_v29, %v429_v46 }
 0x11a   : > { %v433_v48 = vmul.f32 %v431_v47, %v431_v47 }
 0x11c   : > { %v435_v49 = vsel %vm230_vm1, %v433_v48, 0.0 }
 0x11d   : > { %436 = vadd.xlane.f32.xlu1 %v435_v49  ;;  %v421_v50 = vpop.xlane.xlu0 %420 }
 0x11e   : > { %v430_v51 = vmul.f32 %v428_v44, %v421_v50 }
 0x120   : > { %v432_v52 = vsub.f32 %v415_v36, %v430_v51 }
 0x122   : > { %v434_v53 = vmul.f32 %v432_v52, %v432_v52 }
 0x124   : > { %v438_v54 = vsel %vm230_vm1, %v434_v53, 0.0 }
 0x125   : > { %439 = vadd.xlane.f32.xlu1 %v438_v54 }
 0x190   : > { %v437_v55 = vpop.xlane.xlu1 %436 }
 0x191   : > { %v441_v56 = vmul.f32 %v437_v55, %v428_v44 }
 0x193   : > { %v443_v57 = vadd.f32 1e-06, %v441_v56 }
 0x195   : > { %585 = vrsqrt.f32 %v443_v57  ;;  %vm451_vm4 = vweird.f32 %v443_v57 }
 0x198   : > { %v440_v58 = vpop.xlane.xlu1 %439 }
 0x199   : > { %v442_v59 = vmul.f32 %v440_v58, %v428_v44 }
 0x19b   : > { %v586_v60 = vpop.eup %585  ;;  %v444_v61 = vadd.f32 1e-06, %v442_v59 }
 0x19c   : > { %v446_v62 = vmul.f32 %v586_v60, %v443_v57  ;;  %vm452_vm3 = vweird.f32 %v586_v60 }
 0x19d   : > { %587 = vrsqrt.f32 %v444_v61  ;;  %vm453_vm5 = vmor %vm451_vm4, %vm452_vm3  ;;  %vm461_vm7 = vweird.f32 %v444_v61 }
 0x19e   : > { %v447_v63 = vmul.f32 %v586_v60, %v446_v62 }
 0x1a0   : > { %v448_v0 = vmul.f32 0.5, %v447_v63 }
 0x1a2   : > { %v449_v1 = vsub.f32 1.5, %v448_v0 }
 0x1a3   : > { %v588_v2 = vpop.eup %587 }
 0x1a4   : > { %v450_v3 = vmul.f32 %v586_v60, %v449_v1  ;;  %v456_v4 = vmul.f32 %v588_v2, %v444_v61  ;;  %vm462_vm6 = vweird.f32 %v588_v2 }
 0x1a5   : > { %vm463_vm8 = vmor %vm461_vm7, %vm462_vm6 }
 0x1a6   : > { %v454_v6 = vsel %vm453_vm5, %v586_v60, %v450_v3  ;;  %v457_v7 = vmul.f32 %v588_v2, %v456_v4 }
 0x1a7   : > { %v465_v9 = vmul.f32 %v454_v6, %v431_v47 }
 0x1a8   : > { %v458_v10 = vmul.f32 0.5, %v457_v7 }
 0x1a9   : > { %v471_v11 = vmul.f32 %v581_v5, %v465_v9 }
 0x1aa   : > { %v459_v12 = vsub.f32 1.5, %v458_v10 }
 0x1ab   : > { %v477_v13 = vadd.f32 %v582_v8, %v471_v11 }
 0x1ac   : > { %v460_v14 = vmul.f32 %v588_v2, %v459_v12 }
 0x1ad   : > { %v479_v15 = vmax.f32 %v477_v13, 0.0 }
 0x1ae   : > { %v464_v16 = vsel %vm463_vm8, %v588_v2, %v460_v14 }
 0x1af   : > { %481 = vst.msk [vmem:[#allocation2] sm:$0xff] %vm230_vm1, %v479_v15  ;;  %v466_v17 = vmul.f32 %v464_v16, %v432_v52 }
 0x1b1   : > { %v472_v18 = vmul.f32 %v581_v5, %v466_v17 }
 0x1b3   : > { %v478_v19 = vadd.f32 %v582_v8, %v472_v18 }
 0x1b5   : > { %v480_v20 = vmax.f32 %v478_v19, 0.0 }
 0x1b7   : > { %482 = vst.msk [vmem:[#allocation2 + $0x8] sm:$0xff] %vm230_vm1, %v480_v20 }
 0x1be   : > { %v483_v21 = vld [vmem:[#allocation2] ss:$2 sm:$0xff]  ;;  %v485_v22 = vld [vmem:[#allocation2 + $0x1] ss:$2 sm:$0xff] }
 0x1bf   : > { %v486_v23 = vmax.f32 %v483_v21, %v485_v22 }
 0x1c1   : > { %487 = vst.msk [vmem:[%s222_s20] sm:$0xff] %vm230_vm1, %v486_v23 }
 0x1c2 PF: > { %s15_s18 = sadd.s32 1, %s595_s18  }
 0x1c3   : > { %p12_p4 = scmp.ge.s32.totalorder %s15_s18, 4  }
 0x1c5   :  { %14 = sbr.rel (!%p12_p4) target bundleno = 1 (0x1), region = 75 }

</bundles_post_ra>
